<compile_context>
chip_gen: v5e
topology: v5e:2x2
jax: 0.10.0
libtpu: 0.0.40
codegen_flags: <defaults>
</compile_context>

<pallas_src>
import math

import jax
import jax.numpy as jnp
from jax.experimental import pallas as pl
from jax.experimental.pallas import tpu as pltpu

# Module hyper-parameters (from GAT.__init__ defaults)
IN_FEAT = 2
OUT_FEAT = 64
N_HEAD = 4
NEG_SLOPE = 0.2
SKIP = True

# Problem sizes for the demo
BATCH = 2
N_NODES = 8


def gat_kernel(h_ref, ht_ref, wall_ref, wasrc_ref, wadstt_ref, bias_ref,
               out_ref, attn_ref):
    # h_ref     : (BB, N, in_feat)
    # ht_ref    : (BB, in_feat, N)          (h transposed in the wrapper)
    # wall_ref  : (in_feat, H*F)            (fused per-head projection weights)
    # wasrc_ref : (in_feat, H)              (w @ a_src, all heads)
    # wadstt_ref: (H, in_feat)              ((w @ a_dst)^T, all heads)
    # bias_ref  : (1, F)
    # out_ref   : (BB, N, F)
    # attn_ref  : (BB, H, N, N)
    bb, n, _ = h_ref.shape
    n_head = wasrc_ref.shape[-1]
    f = bias_ref.shape[-1]

    w_all = wall_ref[...]                       # (in_feat, H*F)
    wa_src = wasrc_ref[...]                     # (in_feat, H)
    wa_dst_t = wadstt_ref[...]                  # (H, in_feat)
    bias = bias_ref[...]                        # (1, F)

    # Static (unrolled) loops: bb and n_head are small compile-time constants.
    for b in range(bb):
        h_b = h_ref[b]                          # (N, in_feat)
        ht_b = ht_ref[b]                        # (in_feat, N)

        # One lane-dense MXU pass for every head's projection: (N, H*F).
        h_prime_all = jnp.dot(h_b, w_all, preferred_element_type=jnp.float32)

        # Attention logit building blocks for all heads at once.
        #   attn_src_all[i, h]  = h_b[i] . (w_h a_src_h)      -> column form (N, H)
        #   attn_dst_rows[h, j] = h_b[j] . (w_h a_dst_h)      -> row form    (H, N)
        attn_src_all = jnp.dot(h_b, wa_src, preferred_element_type=jnp.float32)
        attn_dst_rows = jnp.dot(wa_dst_t, ht_b, preferred_element_type=jnp.float32)

        # Outer products attn[h, i, j] = src[i, h] * dst[h, j], stacked over
        # heads so LeakyReLU + softmax run in ONE (H, N, N) pass.
        attn_all = jnp.stack(
            [attn_src_all[:, head:head + 1] * attn_dst_rows[head:head + 1, :]
             for head in range(n_head)])                        # (H, N, N)

        # LeakyReLU(0.2)
        attn_all = jnp.where(attn_all > 0, attn_all, NEG_SLOPE * attn_all)

        # Row-wise softmax; divide replaced by EUP approx reciprocal.
        attn_all = attn_all - jnp.max(attn_all, axis=-1, keepdims=True)
        attn_all = jnp.exp(attn_all)
        attn_all = attn_all * pl.reciprocal(
            jnp.sum(attn_all, axis=-1, keepdims=True), approx=True)

        # TODO(synk): nn.Dropout applied as identity (eval-mode semantics);
        # training-mode stochastic dropout and the optional `mask` multiply
        # are not implemented in-kernel (mask=None path only).

        # Head-summed aggregation and skip connection.
        acc = jnp.zeros((n, f), jnp.float32)
        skip = jnp.zeros((n, f), jnp.float32)
        for head in range(n_head):
            h_prime = h_prime_all[:, head * f:(head + 1) * f]   # (N, F)
            acc = acc + jnp.dot(attn_all[head], h_prime,
                                preferred_element_type=jnp.float32)
            skip = skip + h_prime

        out_b = acc + bias                      # broadcast (1, F) over (N, F)
        if SKIP:
            out_b = out_b + skip

        # Single store per batch for each output.
        out_ref[b] = out_b.astype(out_ref.dtype)
        attn_ref[b] = attn_all.astype(attn_ref.dtype)            # (H, N, N)


def _prefer_batch_grid():
    # v7x has 2 TensorCores per chip; a "parallel" batch grid axis is the only
    # way Pallas shards across them. On 1-TC chips (v5e/v6e), folding the whole
    # batch into one grid step avoids ~0.35 us/step overhead and re-DMA of the
    # (invariant) weight blocks.
    try:
        kind = jax.devices()[0].device_kind.lower()
    except Exception:
        return False
    return ("v7" in kind) or ("7x" in kind)


def gat_forward(h, w, a_src, a_dst, bias, batch_grid=None):
    """h: (B, N, in_feat). Returns (out (B,N,F), attn (B,H,N,N))."""
    B, N, in_feat = h.shape
    n_head, _, out_feat = w.shape
    if batch_grid is None:
        batch_grid = _prefer_batch_grid()

    # Wrapper-side layout prep (tiny, one-time XLA ops — "layout plumbing"):
    #   w_all    : (in_feat, H*F)   fused projection weights (lane-dense output)
    #   wa_src   : (in_feat, H)     w_h @ a_src_h for every head
    #   wa_dst_t : (H, in_feat)     (w_h @ a_dst_h)^T for every head
    w_all = jnp.transpose(w, (1, 0, 2)).reshape(in_feat, n_head * out_feat)
    wa_src = jnp.einsum("hif,hfo->ih", w, a_src)
    wa_dst_t = jnp.einsum("hif,hfo->hi", w, a_dst)
    bias2 = bias.reshape(1, out_feat)
    h_t = jnp.swapaxes(h, 1, 2)                  # (B, in_feat, N)

    bb = 1 if batch_grid else B                  # batch block per grid step
    grid = (B // bb,)

    out_shapes = (
        jax.ShapeDtypeStruct((B, N, out_feat), jnp.float32),
        jax.ShapeDtypeStruct((B, n_head, N, N), jnp.float32),
    )

    # Advisory cost estimate for XLA's scheduler.
    flops = (2 * B * N * in_feat * n_head * out_feat        # fused projection
             + 2 * B * N * in_feat * n_head * 2             # w@a score dots
             + 2 * B * n_head * N * N * out_feat            # attn @ h_prime
             + 5 * B * n_head * N * N)                      # outer/lrelu/softmax VPU
    transcendentals = B * n_head * N * (N + 1)              # exp + reciprocal
    itemsize = 4
    bytes_accessed = itemsize * (
        2 * B * N * in_feat                                  # h and h_t
        + in_feat * n_head * out_feat + 2 * n_head * in_feat + out_feat
        + B * N * out_feat + B * n_head * N * N)
    cost = pl.CostEstimate(flops=int(flops),
                           transcendentals=int(transcendentals),
                           bytes_accessed=int(bytes_accessed))

    return pl.pallas_call(
        gat_kernel,
        out_shape=out_shapes,
        grid_spec=pltpu.PrefetchScalarGridSpec(
            num_scalar_prefetch=0,
            grid=grid,
            in_specs=[
                pl.BlockSpec((bb, N, in_feat), lambda i: (i, 0, 0)),
                pl.BlockSpec((bb, in_feat, N), lambda i: (i, 0, 0)),
                # Grid-invariant weights: constant index_map -> not re-fetched.
                pl.BlockSpec((in_feat, n_head * out_feat), lambda i: (0, 0)),
                pl.BlockSpec((in_feat, n_head), lambda i: (0, 0)),
                pl.BlockSpec((n_head, in_feat), lambda i: (0, 0)),
                pl.BlockSpec((1, out_feat), lambda i: (0, 0)),
            ],
            out_specs=[
                pl.BlockSpec((bb, N, out_feat), lambda i: (i, 0, 0)),
                pl.BlockSpec((bb, n_head, N, N), lambda i: (i, 0, 0, 0)),
            ],
        ),
        compiler_params=pltpu.CompilerParams(
            dimension_semantics=("parallel",)),
        cost_estimate=cost,
    )(h, h_t, w_all, wa_src, wa_dst_t, bias2)


def gat_reference(h, w, a_src, a_dst, bias):
    """Pure-JAX reference mirroring the PyTorch forward (eval-mode dropout)."""
    h_prime = jnp.einsum("bni,hif->bhnf", h, w)                 # (B,H,N,F)
    attn_src = jnp.einsum("bhnf,hfo->bhno", h_prime, a_src)     # (B,H,N,1)
    attn_dst = jnp.einsum("bhnf,hfo->bhno", h_prime, a_dst)     # (B,H,N,1)
    attn = attn_src @ jnp.swapaxes(attn_dst, -1, -2)            # (B,H,N,N)
    attn = jnp.where(attn > 0, attn, NEG_SLOPE * attn)
    attn = jax.nn.softmax(attn, axis=-1)
    out = jnp.einsum("bhnm,bhmf->bnf", attn, h_prime) + bias
    if SKIP:
        out = out + h_prime.sum(axis=1)
    return out, attn


def xavier_uniform(key, shape, gain):
    # PyTorch fan calc for >2D: fan_in = size(1)*prod(size[2:]), fan_out = size(0)*prod(size[2:])
    receptive = 1
    for s in shape[2:]:
        receptive *= s
    fan_in = shape[1] * receptive
    fan_out = shape[0] * receptive
    bound = gain * math.sqrt(6.0 / (fan_in + fan_out))
    return jax.random.uniform(key, shape, jnp.float32, minval=-bound, maxval=bound)


if __name__ == "__main__":
    key = jax.random.PRNGKey(0)
    k_h, k_w, k_src, k_dst = jax.random.split(key, 4)

    h = jax.random.normal(k_h, (BATCH, N_NODES, IN_FEAT), jnp.float32)
    w = xavier_uniform(k_w, (N_HEAD, IN_FEAT, OUT_FEAT), gain=1.414)
    a_src = xavier_uniform(k_src, (N_HEAD, OUT_FEAT, 1), gain=1.414)
    a_dst = xavier_uniform(k_dst, (N_HEAD, OUT_FEAT, 1), gain=1.414)
    bias = jnp.zeros((OUT_FEAT,), jnp.float32)

    out, attn = gat_forward(h, w, a_src, a_dst, bias)
    jax.block_until_ready((out, attn))

    out_exp, attn_exp = gat_reference(h, w, a_src, a_dst, bias)
    assert out.shape == (BATCH, N_NODES, OUT_FEAT)
    assert attn.shape == (BATCH, N_HEAD, N_NODES, N_NODES)
    # Slightly relaxed tolerance: softmax uses the EUP approx reciprocal and
    # the wrapper pre-folds w@a (different fp32 rounding order than reference).
    assert jnp.allclose(out, out_exp, rtol=2e-3, atol=2e-3)
    assert jnp.allclose(attn, attn_exp, rtol=2e-3, atol=2e-3)

    print("KERNEL_OK")
</pallas_src>

<mosaic_0001>
module attributes {stable_mosaic.version = 11 : i64} {
  func.func @gat_kernel(%arg0: i32, %arg1: memref<2x8x2xf32, #tpu.memory_space<vmem>>, %arg2: memref<2x2x8xf32, #tpu.memory_space<vmem>>, %arg3: memref<2x256xf32, #tpu.memory_space<vmem>>, %arg4: memref<2x4xf32, #tpu.memory_space<vmem>>, %arg5: memref<4x2xf32, #tpu.memory_space<vmem>>, %arg6: memref<1x64xf32, #tpu.memory_space<vmem>>, %arg7: memref<2x8x64xf32, #tpu.memory_space<vmem>>, %arg8: memref<2x4x8x8xf32, #tpu.memory_space<vmem>>) attributes {dimension_semantics = [#tpu.dimension_semantics<parallel>], iteration_bounds = array<i64: 1>, scalar_prefetch = 0 : i64, scratch_operands = 0 : i64, tpu.core_type = #tpu.core_type<tc>, window_params = [{transform_indices = @transform_0, window_bounds = array<i64: 2, 8, 2>}, {transform_indices = @transform_1, window_bounds = array<i64: 2, 2, 8>}, {pipeline_mode = #tpu.pipeline_mode<synchronous>, transform_indices = @transform_2, window_bounds = array<i64: 2, 256>}, {pipeline_mode = #tpu.pipeline_mode<synchronous>, transform_indices = @transform_3, window_bounds = array<i64: 2, 4>}, {pipeline_mode = #tpu.pipeline_mode<synchronous>, transform_indices = @transform_4, window_bounds = array<i64: 4, 2>}, {pipeline_mode = #tpu.pipeline_mode<synchronous>, transform_indices = @transform_5, window_bounds = array<i64: 1, 64>}, {transform_indices = @transform_6, window_bounds = array<i64: 2, 8, 64>}, {transform_indices = @transform_7, window_bounds = array<i64: 2, 4, 8, 8>}]} {
    %c0 = arith.constant 0 : index
    %c0_0 = arith.constant 0 : index
    %0 = vector.load %arg3[%c0, %c0_0] : memref<2x256xf32, #tpu.memory_space<vmem>>, vector<2x256xf32>
    %c0_1 = arith.constant 0 : index
    %c0_2 = arith.constant 0 : index
    %1 = vector.load %arg4[%c0_1, %c0_2] : memref<2x4xf32, #tpu.memory_space<vmem>>, vector<2x4xf32>
    %c0_3 = arith.constant 0 : index
    %c0_4 = arith.constant 0 : index
    %2 = vector.load %arg5[%c0_3, %c0_4] : memref<4x2xf32, #tpu.memory_space<vmem>>, vector<4x2xf32>
    %c0_5 = arith.constant 0 : index
    %c0_6 = arith.constant 0 : index
    %3 = vector.load %arg6[%c0_5, %c0_6] : memref<1x64xf32, #tpu.memory_space<vmem>>, vector<1x64xf32>
    %c0_7 = arith.constant 0 : index
    %c0_8 = arith.constant 0 : index
    %c0_9 = arith.constant 0 : index
    %4 = vector.load %arg1[%c0_7, %c0_8, %c0_9] : memref<2x8x2xf32, #tpu.memory_space<vmem>>, vector<1x8x2xf32>
    %5 = vector.shape_cast %4 : vector<1x8x2xf32> to vector<8x2xf32>
    %c0_10 = arith.constant 0 : index
    %c0_11 = arith.constant 0 : index
    %c0_12 = arith.constant 0 : index
    %6 = vector.load %arg2[%c0_10, %c0_11, %c0_12] : memref<2x2x8xf32, #tpu.memory_space<vmem>>, vector<1x2x8xf32>
    %7 = vector.shape_cast %6 : vector<1x2x8xf32> to vector<2x8xf32>
    %cst = arith.constant dense<0.000000e+00> : vector<8x256xf32>
    %8 = tpu.matmul %5, %0, %cst {dimension_numbers = #tpu.dot_dimension_numbers<[1], [0], [0], [1], [0, 0, 1, 1], [], []>} : vector<8x2xf32>, vector<2x256xf32>, vector<8x256xf32> -> vector<8x256xf32>
    %cst_13 = arith.constant dense<0.000000e+00> : vector<8x4xf32>
    %9 = tpu.matmul %5, %1, %cst_13 {dimension_numbers = #tpu.dot_dimension_numbers<[1], [0], [0], [1], [0, 0, 1, 1], [], []>} : vector<8x2xf32>, vector<2x4xf32>, vector<8x4xf32> -> vector<8x4xf32>
    %cst_14 = arith.constant dense<0.000000e+00> : vector<4x8xf32>
    %10 = tpu.matmul %2, %7, %cst_14 {dimension_numbers = #tpu.dot_dimension_numbers<[1], [0], [0], [1], [0, 0, 1, 1], [], []>} : vector<4x2xf32>, vector<2x8xf32>, vector<4x8xf32> -> vector<4x8xf32>
    %11 = vector.extract_strided_slice %9 {offsets = [0, 0], sizes = [8, 1], strides = [1, 1]} : vector<8x4xf32> to vector<8x1xf32>
    %12 = vector.extract_strided_slice %10 {offsets = [0, 0], sizes = [1, 8], strides = [1, 1]} : vector<4x8xf32> to vector<1x8xf32>
    %13 = vector.broadcast %11 : vector<8x1xf32> to vector<8x8xf32>
    %14 = vector.broadcast %12 : vector<1x8xf32> to vector<8x8xf32>
    %15 = arith.mulf %13, %14 : vector<8x8xf32>
    %16 = vector.extract_strided_slice %9 {offsets = [0, 1], sizes = [8, 1], strides = [1, 1]} : vector<8x4xf32> to vector<8x1xf32>
    %17 = vector.extract_strided_slice %10 {offsets = [1, 0], sizes = [1, 8], strides = [1, 1]} : vector<4x8xf32> to vector<1x8xf32>
    %18 = vector.broadcast %16 : vector<8x1xf32> to vector<8x8xf32>
    %19 = vector.broadcast %17 : vector<1x8xf32> to vector<8x8xf32>
    %20 = arith.mulf %18, %19 : vector<8x8xf32>
    %21 = vector.extract_strided_slice %9 {offsets = [0, 2], sizes = [8, 1], strides = [1, 1]} : vector<8x4xf32> to vector<8x1xf32>
    %22 = vector.extract_strided_slice %10 {offsets = [2, 0], sizes = [1, 8], strides = [1, 1]} : vector<4x8xf32> to vector<1x8xf32>
    %23 = vector.broadcast %21 : vector<8x1xf32> to vector<8x8xf32>
    %24 = vector.broadcast %22 : vector<1x8xf32> to vector<8x8xf32>
    %25 = arith.mulf %23, %24 : vector<8x8xf32>
    %26 = vector.extract_strided_slice %9 {offsets = [0, 3], sizes = [8, 1], strides = [1, 1]} : vector<8x4xf32> to vector<8x1xf32>
    %27 = vector.extract_strided_slice %10 {offsets = [3, 0], sizes = [1, 8], strides = [1, 1]} : vector<4x8xf32> to vector<1x8xf32>
    %28 = vector.broadcast %26 : vector<8x1xf32> to vector<8x8xf32>
    %29 = vector.broadcast %27 : vector<1x8xf32> to vector<8x8xf32>
    %30 = arith.mulf %28, %29 : vector<8x8xf32>
    %31 = vector.shape_cast %15 : vector<8x8xf32> to vector<1x8x8xf32>
    %32 = vector.shape_cast %20 : vector<8x8xf32> to vector<1x8x8xf32>
    %33 = vector.shape_cast %25 : vector<8x8xf32> to vector<1x8x8xf32>
    %34 = vector.shape_cast %30 : vector<8x8xf32> to vector<1x8x8xf32>
    %35 = tpu.concatenate %31, %32, %33, %34 in 0 : vector<1x8x8xf32>, vector<1x8x8xf32>, vector<1x8x8xf32>, vector<1x8x8xf32> -> vector<4x8x8xf32>
    %cst_15 = arith.constant 0.000000e+00 : f32
    %36 = vector.broadcast %cst_15 : f32 to vector<4x8x8xf32>
    %37 = arith.cmpf ogt, %35, %36 : vector<4x8x8xf32>
    %cst_16 = arith.constant 2.000000e-01 : f32
    %38 = vector.broadcast %cst_16 : f32 to vector<4x8x8xf32>
    %39 = arith.mulf %38, %35 : vector<4x8x8xf32>
    %40 = arith.select %37, %35, %39 : vector<4x8x8xi1>, vector<4x8x8xf32>
    %cst_17 = arith.constant dense<0xFF800000> : vector<4x8xf32>
    %41 = vector.multi_reduction <maximumf>, %40, %cst_17 [2] : vector<4x8x8xf32> to vector<4x8xf32>
    %42 = vector.shape_cast %41 : vector<4x8xf32> to vector<4x8x1xf32>
    %43 = vector.broadcast %42 : vector<4x8x1xf32> to vector<4x8x8xf32>
    %44 = arith.subf %40, %43 : vector<4x8x8xf32>
    %45 = math.exp %44 : vector<4x8x8xf32>
    %cst_18 = arith.constant dense<0.000000e+00> : vector<4x8xf32>
    %46 = vector.multi_reduction <add>, %45, %cst_18 [2] : vector<4x8x8xf32> to vector<4x8xf32>
    %47 = vector.shape_cast %46 : vector<4x8xf32> to vector<4x8x1xf32>
    %48 = tpu.reciprocal %47 {approx = true} : vector<4x8x1xf32> -> vector<4x8x1xf32>
    %49 = vector.broadcast %48 : vector<4x8x1xf32> to vector<4x8x8xf32>
    %50 = arith.mulf %45, %49 : vector<4x8x8xf32>
    %cst_19 = arith.constant 0.000000e+00 : f32
    %51 = vector.broadcast %cst_19 : f32 to vector<8x64xf32>
    %cst_20 = arith.constant 0.000000e+00 : f32
    %52 = vector.broadcast %cst_20 : f32 to vector<8x64xf32>
    %53 = vector.extract_strided_slice %8 {offsets = [0, 0], sizes = [8, 64], strides = [1, 1]} : vector<8x256xf32> to vector<8x64xf32>
    %54 = vector.extract_strided_slice %50 {offsets = [0, 0, 0], sizes = [1, 8, 8], strides = [1, 1, 1]} : vector<4x8x8xf32> to vector<1x8x8xf32>
    %55 = vector.shape_cast %54 : vector<1x8x8xf32> to vector<8x8xf32>
    %cst_21 = arith.constant dense<0.000000e+00> : vector<8x64xf32>
    %56 = tpu.matmul %55, %53, %cst_21 {dimension_numbers = #tpu.dot_dimension_numbers<[1], [0], [0], [1], [0, 0, 1, 1], [], []>} : vector<8x8xf32>, vector<8x64xf32>, vector<8x64xf32> -> vector<8x64xf32>
    %57 = arith.addf %51, %56 : vector<8x64xf32>
    %58 = arith.addf %52, %53 : vector<8x64xf32>
    %59 = vector.extract_strided_slice %8 {offsets = [0, 64], sizes = [8, 64], strides = [1, 1]} : vector<8x256xf32> to vector<8x64xf32>
    %60 = vector.extract_strided_slice %50 {offsets = [1, 0, 0], sizes = [1, 8, 8], strides = [1, 1, 1]} : vector<4x8x8xf32> to vector<1x8x8xf32>
    %61 = vector.shape_cast %60 : vector<1x8x8xf32> to vector<8x8xf32>
    %cst_22 = arith.constant dense<0.000000e+00> : vector<8x64xf32>
    %62 = tpu.matmul %61, %59, %cst_22 {dimension_numbers = #tpu.dot_dimension_numbers<[1], [0], [0], [1], [0, 0, 1, 1], [], []>} : vector<8x8xf32>, vector<8x64xf32>, vector<8x64xf32> -> vector<8x64xf32>
    %63 = arith.addf %57, %62 : vector<8x64xf32>
    %64 = arith.addf %58, %59 : vector<8x64xf32>
    %65 = vector.extract_strided_slice %8 {offsets = [0, 128], sizes = [8, 64], strides = [1, 1]} : vector<8x256xf32> to vector<8x64xf32>
    %66 = vector.extract_strided_slice %50 {offsets = [2, 0, 0], sizes = [1, 8, 8], strides = [1, 1, 1]} : vector<4x8x8xf32> to vector<1x8x8xf32>
    %67 = vector.shape_cast %66 : vector<1x8x8xf32> to vector<8x8xf32>
    %cst_23 = arith.constant dense<0.000000e+00> : vector<8x64xf32>
    %68 = tpu.matmul %67, %65, %cst_23 {dimension_numbers = #tpu.dot_dimension_numbers<[1], [0], [0], [1], [0, 0, 1, 1], [], []>} : vector<8x8xf32>, vector<8x64xf32>, vector<8x64xf32> -> vector<8x64xf32>
    %69 = arith.addf %63, %68 : vector<8x64xf32>
    %70 = arith.addf %64, %65 : vector<8x64xf32>
    %71 = vector.extract_strided_slice %8 {offsets = [0, 192], sizes = [8, 64], strides = [1, 1]} : vector<8x256xf32> to vector<8x64xf32>
    %72 = vector.extract_strided_slice %50 {offsets = [3, 0, 0], sizes = [1, 8, 8], strides = [1, 1, 1]} : vector<4x8x8xf32> to vector<1x8x8xf32>
    %73 = vector.shape_cast %72 : vector<1x8x8xf32> to vector<8x8xf32>
    %cst_24 = arith.constant dense<0.000000e+00> : vector<8x64xf32>
    %74 = tpu.matmul %73, %71, %cst_24 {dimension_numbers = #tpu.dot_dimension_numbers<[1], [0], [0], [1], [0, 0, 1, 1], [], []>} : vector<8x8xf32>, vector<8x64xf32>, vector<8x64xf32> -> vector<8x64xf32>
    %75 = arith.addf %69, %74 : vector<8x64xf32>
    %76 = arith.addf %70, %71 : vector<8x64xf32>
    %77 = vector.broadcast %3 : vector<1x64xf32> to vector<8x64xf32>
    %78 = arith.addf %75, %77 : vector<8x64xf32>
    %79 = arith.addf %78, %76 : vector<8x64xf32>
    %c0_25 = arith.constant 0 : index
    %c0_26 = arith.constant 0 : index
    %c0_27 = arith.constant 0 : index
    %80 = vector.load %arg7[%c0_25, %c0_26, %c0_27] : memref<2x8x64xf32, #tpu.memory_space<vmem>>, vector<1x8x64xf32>
    %81 = vector.shape_cast %80 : vector<1x8x64xf32> to vector<8x64xf32>
    %82 = vector.shape_cast %79 : vector<8x64xf32> to vector<1x8x64xf32>
    tpu.vector_store %arg7[%c0_25, %c0_26, %c0_27], %82 {strides = array<i32>} : memref<2x8x64xf32, #tpu.memory_space<vmem>>, vector<1x8x64xf32>,
    %c0_28 = arith.constant 0 : index
    %c0_29 = arith.constant 0 : index
    %c0_30 = arith.constant 0 : index
    %c0_31 = arith.constant 0 : index
    %83 = vector.load %arg8[%c0_28, %c0_29, %c0_30, %c0_31] : memref<2x4x8x8xf32, #tpu.memory_space<vmem>>, vector<1x4x8x8xf32>
    %84 = vector.shape_cast %83 : vector<1x4x8x8xf32> to vector<4x8x8xf32>
    %85 = vector.shape_cast %50 : vector<4x8x8xf32> to vector<1x4x8x8xf32>
    tpu.vector_store %arg8[%c0_28, %c0_29, %c0_30, %c0_31], %85 {strides = array<i32>} : memref<2x4x8x8xf32, #tpu.memory_space<vmem>>, vector<1x4x8x8xf32>,
    %c1 = arith.constant 1 : index
    %c0_32 = arith.constant 0 : index
    %c0_33 = arith.constant 0 : index
    %86 = vector.load %arg1[%c1, %c0_32, %c0_33] : memref<2x8x2xf32, #tpu.memory_space<vmem>>, vector<1x8x2xf32>
    %87 = vector.shape_cast %86 : vector<1x8x2xf32> to vector<8x2xf32>
    %c1_34 = arith.constant 1 : index
    %c0_35 = arith.constant 0 : index
    %c0_36 = arith.constant 0 : index
    %88 = vector.load %arg2[%c1_34, %c0_35, %c0_36] : memref<2x2x8xf32, #tpu.memory_space<vmem>>, vector<1x2x8xf32>
    %89 = vector.shape_cast %88 : vector<1x2x8xf32> to vector<2x8xf32>
    %cst_37 = arith.constant dense<0.000000e+00> : vector<8x256xf32>
    %90 = tpu.matmul %87, %0, %cst_37 {dimension_numbers = #tpu.dot_dimension_numbers<[1], [0], [0], [1], [0, 0, 1, 1], [], []>} : vector<8x2xf32>, vector<2x256xf32>, vector<8x256xf32> -> vector<8x256xf32>
    %cst_38 = arith.constant dense<0.000000e+00> : vector<8x4xf32>
    %91 = tpu.matmul %87, %1, %cst_38 {dimension_numbers = #tpu.dot_dimension_numbers<[1], [0], [0], [1], [0, 0, 1, 1], [], []>} : vector<8x2xf32>, vector<2x4xf32>, vector<8x4xf32> -> vector<8x4xf32>
    %cst_39 = arith.constant dense<0.000000e+00> : vector<4x8xf32>
    %92 = tpu.matmul %2, %89, %cst_39 {dimension_numbers = #tpu.dot_dimension_numbers<[1], [0], [0], [1], [0, 0, 1, 1], [], []>} : vector<4x2xf32>, vector<2x8xf32>, vector<4x8xf32> -> vector<4x8xf32>
    %93 = vector.extract_strided_slice %91 {offsets = [0, 0], sizes = [8, 1], strides = [1, 1]} : vector<8x4xf32> to vector<8x1xf32>
    %94 = vector.extract_strided_slice %92 {offsets = [0, 0], sizes = [1, 8], strides = [1, 1]} : vector<4x8xf32> to vector<1x8xf32>
    %95 = vector.broadcast %93 : vector<8x1xf32> to vector<8x8xf32>
    %96 = vector.broadcast %94 : vector<1x8xf32> to vector<8x8xf32>
    %97 = arith.mulf %95, %96 : vector<8x8xf32>
    %98 = vector.extract_strided_slice %91 {offsets = [0, 1], sizes = [8, 1], strides = [1, 1]} : vector<8x4xf32> to vector<8x1xf32>
    %99 = vector.extract_strided_slice %92 {offsets = [1, 0], sizes = [1, 8], strides = [1, 1]} : vector<4x8xf32> to vector<1x8xf32>
    %100 = vector.broadcast %98 : vector<8x1xf32> to vector<8x8xf32>
    %101 = vector.broadcast %99 : vector<1x8xf32> to vector<8x8xf32>
    %102 = arith.mulf %100, %101 : vector<8x8xf32>
    %103 = vector.extract_strided_slice %91 {offsets = [0, 2], sizes = [8, 1], strides = [1, 1]} : vector<8x4xf32> to vector<8x1xf32>
    %104 = vector.extract_strided_slice %92 {offsets = [2, 0], sizes = [1, 8], strides = [1, 1]} : vector<4x8xf32> to vector<1x8xf32>
    %105 = vector.broadcast %103 : vector<8x1xf32> to vector<8x8xf32>
    %106 = vector.broadcast %104 : vector<1x8xf32> to vector<8x8xf32>
    %107 = arith.mulf %105, %106 : vector<8x8xf32>
    %108 = vector.extract_strided_slice %91 {offsets = [0, 3], sizes = [8, 1], strides = [1, 1]} : vector<8x4xf32> to vector<8x1xf32>
    %109 = vector.extract_strided_slice %92 {offsets = [3, 0], sizes = [1, 8], strides = [1, 1]} : vector<4x8xf32> to vector<1x8xf32>
    %110 = vector.broadcast %108 : vector<8x1xf32> to vector<8x8xf32>
    %111 = vector.broadcast %109 : vector<1x8xf32> to vector<8x8xf32>
    %112 = arith.mulf %110, %111 : vector<8x8xf32>
    %113 = vector.shape_cast %97 : vector<8x8xf32> to vector<1x8x8xf32>
    %114 = vector.shape_cast %102 : vector<8x8xf32> to vector<1x8x8xf32>
    %115 = vector.shape_cast %107 : vector<8x8xf32> to vector<1x8x8xf32>
    %116 = vector.shape_cast %112 : vector<8x8xf32> to vector<1x8x8xf32>
    %117 = tpu.concatenate %113, %114, %115, %116 in 0 : vector<1x8x8xf32>, vector<1x8x8xf32>, vector<1x8x8xf32>, vector<1x8x8xf32> -> vector<4x8x8xf32>
    %cst_40 = arith.constant 0.000000e+00 : f32
    %118 = vector.broadcast %cst_40 : f32 to vector<4x8x8xf32>
    %119 = arith.cmpf ogt, %117, %118 : vector<4x8x8xf32>
    %cst_41 = arith.constant 2.000000e-01 : f32
    %120 = vector.broadcast %cst_41 : f32 to vector<4x8x8xf32>
    %121 = arith.mulf %120, %117 : vector<4x8x8xf32>
    %122 = arith.select %119, %117, %121 : vector<4x8x8xi1>, vector<4x8x8xf32>
    %cst_42 = arith.constant dense<0xFF800000> : vector<4x8xf32>
    %123 = vector.multi_reduction <maximumf>, %122, %cst_42 [2] : vector<4x8x8xf32> to vector<4x8xf32>
    %124 = vector.shape_cast %123 : vector<4x8xf32> to vector<4x8x1xf32>
    %125 = vector.broadcast %124 : vector<4x8x1xf32> to vector<4x8x8xf32>
    %126 = arith.subf %122, %125 : vector<4x8x8xf32>
    %127 = math.exp %126 : vector<4x8x8xf32>
    %cst_43 = arith.constant dense<0.000000e+00> : vector<4x8xf32>
    %128 = vector.multi_reduction <add>, %127, %cst_43 [2] : vector<4x8x8xf32> to vector<4x8xf32>
    %129 = vector.shape_cast %128 : vector<4x8xf32> to vector<4x8x1xf32>
    %130 = tpu.reciprocal %129 {approx = true} : vector<4x8x1xf32> -> vector<4x8x1xf32>
    %131 = vector.broadcast %130 : vector<4x8x1xf32> to vector<4x8x8xf32>
    %132 = arith.mulf %127, %131 : vector<4x8x8xf32>
    %cst_44 = arith.constant 0.000000e+00 : f32
    %133 = vector.broadcast %cst_44 : f32 to vector<8x64xf32>
    %cst_45 = arith.constant 0.000000e+00 : f32
    %134 = vector.broadcast %cst_45 : f32 to vector<8x64xf32>
    %135 = vector.extract_strided_slice %90 {offsets = [0, 0], sizes = [8, 64], strides = [1, 1]} : vector<8x256xf32> to vector<8x64xf32>
    %136 = vector.extract_strided_slice %132 {offsets = [0, 0, 0], sizes = [1, 8, 8], strides = [1, 1, 1]} : vector<4x8x8xf32> to vector<1x8x8xf32>
    %137 = vector.shape_cast %136 : vector<1x8x8xf32> to vector<8x8xf32>
    %cst_46 = arith.constant dense<0.000000e+00> : vector<8x64xf32>
    %138 = tpu.matmul %137, %135, %cst_46 {dimension_numbers = #tpu.dot_dimension_numbers<[1], [0], [0], [1], [0, 0, 1, 1], [], []>} : vector<8x8xf32>, vector<8x64xf32>, vector<8x64xf32> -> vector<8x64xf32>
    %139 = arith.addf %133, %138 : vector<8x64xf32>
    %140 = arith.addf %134, %135 : vector<8x64xf32>
    %141 = vector.extract_strided_slice %90 {offsets = [0, 64], sizes = [8, 64], strides = [1, 1]} : vector<8x256xf32> to vector<8x64xf32>
    %142 = vector.extract_strided_slice %132 {offsets = [1, 0, 0], sizes = [1, 8, 8], strides = [1, 1, 1]} : vector<4x8x8xf32> to vector<1x8x8xf32>
    %143 = vector.shape_cast %142 : vector<1x8x8xf32> to vector<8x8xf32>
    %cst_47 = arith.constant dense<0.000000e+00> : vector<8x64xf32>
    %144 = tpu.matmul %143, %141, %cst_47 {dimension_numbers = #tpu.dot_dimension_numbers<[1], [0], [0], [1], [0, 0, 1, 1], [], []>} : vector<8x8xf32>, vector<8x64xf32>, vector<8x64xf32> -> vector<8x64xf32>
    %145 = arith.addf %139, %144 : vector<8x64xf32>
    %146 = arith.addf %140, %141 : vector<8x64xf32>
    %147 = vector.extract_strided_slice %90 {offsets = [0, 128], sizes = [8, 64], strides = [1, 1]} : vector<8x256xf32> to vector<8x64xf32>
    %148 = vector.extract_strided_slice %132 {offsets = [2, 0, 0], sizes = [1, 8, 8], strides = [1, 1, 1]} : vector<4x8x8xf32> to vector<1x8x8xf32>
    %149 = vector.shape_cast %148 : vector<1x8x8xf32> to vector<8x8xf32>
    %cst_48 = arith.constant dense<0.000000e+00> : vector<8x64xf32>
    %150 = tpu.matmul %149, %147, %cst_48 {dimension_numbers = #tpu.dot_dimension_numbers<[1], [0], [0], [1], [0, 0, 1, 1], [], []>} : vector<8x8xf32>, vector<8x64xf32>, vector<8x64xf32> -> vector<8x64xf32>
    %151 = arith.addf %145, %150 : vector<8x64xf32>
    %152 = arith.addf %146, %147 : vector<8x64xf32>
    %153 = vector.extract_strided_slice %90 {offsets = [0, 192], sizes = [8, 64], strides = [1, 1]} : vector<8x256xf32> to vector<8x64xf32>
    %154 = vector.extract_strided_slice %132 {offsets = [3, 0, 0], sizes = [1, 8, 8], strides = [1, 1, 1]} : vector<4x8x8xf32> to vector<1x8x8xf32>
    %155 = vector.shape_cast %154 : vector<1x8x8xf32> to vector<8x8xf32>
    %cst_49 = arith.constant dense<0.000000e+00> : vector<8x64xf32>
    %156 = tpu.matmul %155, %153, %cst_49 {dimension_numbers = #tpu.dot_dimension_numbers<[1], [0], [0], [1], [0, 0, 1, 1], [], []>} : vector<8x8xf32>, vector<8x64xf32>, vector<8x64xf32> -> vector<8x64xf32>
    %157 = arith.addf %151, %156 : vector<8x64xf32>
    %158 = arith.addf %152, %153 : vector<8x64xf32>
    %159 = vector.broadcast %3 : vector<1x64xf32> to vector<8x64xf32>
    %160 = arith.addf %157, %159 : vector<8x64xf32>
    %161 = arith.addf %160, %158 : vector<8x64xf32>
    %c1_50 = arith.constant 1 : index
    %c0_51 = arith.constant 0 : index
    %c0_52 = arith.constant 0 : index
    %162 = vector.load %arg7[%c1_50, %c0_51, %c0_52] : memref<2x8x64xf32, #tpu.memory_space<vmem>>, vector<1x8x64xf32>
    %163 = vector.shape_cast %162 : vector<1x8x64xf32> to vector<8x64xf32>
    %164 = vector.shape_cast %161 : vector<8x64xf32> to vector<1x8x64xf32>
    tpu.vector_store %arg7[%c1_50, %c0_51, %c0_52], %164 {strides = array<i32>} : memref<2x8x64xf32, #tpu.memory_space<vmem>>, vector<1x8x64xf32>,
    %c1_53 = arith.constant 1 : index
    %c0_54 = arith.constant 0 : index
    %c0_55 = arith.constant 0 : index
    %c0_56 = arith.constant 0 : index
    %165 = vector.load %arg8[%c1_53, %c0_54, %c0_55, %c0_56] : memref<2x4x8x8xf32, #tpu.memory_space<vmem>>, vector<1x4x8x8xf32>
    %166 = vector.shape_cast %165 : vector<1x4x8x8xf32> to vector<4x8x8xf32>
    %167 = vector.shape_cast %132 : vector<4x8x8xf32> to vector<1x4x8x8xf32>
    tpu.vector_store %arg8[%c1_53, %c0_54, %c0_55, %c0_56], %167 {strides = array<i32>} : memref<2x4x8x8xf32, #tpu.memory_space<vmem>>, vector<1x4x8x8xf32>,
    return
  }
  func.func @transform_0(%arg0: i32) -> (i32, i32, i32) {
    %c0_i32 = arith.constant 0 : i32
    %c0_i32_0 = arith.constant 0 : i32
    %c0_i32_1 = arith.constant 0 : i32
    return %arg0, %c0_i32, %c0_i32_0 : i32, i32, i32
  }
  func.func @transform_1(%arg0: i32) -> (i32, i32, i32) {
    %c0_i32 = arith.constant 0 : i32
    %c0_i32_0 = arith.constant 0 : i32
    %c0_i32_1 = arith.constant 0 : i32
    return %arg0, %c0_i32, %c0_i32_0 : i32, i32, i32
  }
  func.func @transform_2(%arg0: i32) -> (i32, i32) {
    %c0_i32 = arith.constant 0 : i32
    %c0_i32_0 = arith.constant 0 : i32
    %c0_i32_1 = arith.constant 0 : i32
    return %c0_i32, %c0_i32_0 : i32, i32
  }
  func.func @transform_3(%arg0: i32) -> (i32, i32) {
    %c0_i32 = arith.constant 0 : i32
    %c0_i32_0 = arith.constant 0 : i32
    %c0_i32_1 = arith.constant 0 : i32
    return %c0_i32, %c0_i32_0 : i32, i32
  }
  func.func @transform_4(%arg0: i32) -> (i32, i32) {
    %c0_i32 = arith.constant 0 : i32
    %c0_i32_0 = arith.constant 0 : i32
    %c0_i32_1 = arith.constant 0 : i32
    return %c0_i32, %c0_i32_0 : i32, i32
  }
  func.func @transform_5(%arg0: i32) -> (i32, i32) {
    %c0_i32 = arith.constant 0 : i32
    %c0_i32_0 = arith.constant 0 : i32
    %c0_i32_1 = arith.constant 0 : i32
    return %c0_i32, %c0_i32_0 : i32, i32
  }
  func.func @transform_6(%arg0: i32) -> (i32, i32, i32) {
    %c0_i32 = arith.constant 0 : i32
    %c0_i32_0 = arith.constant 0 : i32
    %c0_i32_1 = arith.constant 0 : i32
    return %arg0, %c0_i32, %c0_i32_0 : i32, i32, i32
  }
  func.func @transform_7(%arg0: i32) -> (i32, i32, i32, i32) {
    %c0_i32 = arith.constant 0 : i32
    %c0_i32_0 = arith.constant 0 : i32
    %c0_i32_1 = arith.constant 0 : i32
    %c0_i32_2 = arith.constant 0 : i32
    return %arg0, %c0_i32, %c0_i32_0, %c0_i32_1 : i32, i32, i32, i32
  }
}

</mosaic_0001>

<bundles_post_ra>
// kernel: tpu_custom_call.1
= control target key start
LH: loop header
LB: loop body
LE: loop exit
PB: predicated region body
PF: predicated region fallthrough
CT: control target
= control target key end

     0   :  { %13 = vsyncpa [#allocation3], 0  ;;  %vm41_vm0 = vcmask 1041408   ;;  %vm37_vm1 = vcmask 15360   ;;  %v791_v4 = vmov 2   ;;  %s958_s0 = inlined_call_operand.vmem [shape: f32[2,8,2], index: 0, kind: input, shape index: {}]   ;;  %s959_s1 = inlined_call_operand.vmem [shape: f32[2,2,8], index: 1, kind: input, shape index: {}]   ;;  %s960_s2 = inlined_call_operand.vmem [shape: f32[2,256], index: 2, kind: input, shape index: {}]   ;;  %s961_s3 = inlined_call_operand.vmem [shape: f32[2,4], index: 3, kind: input, shape index: {}]   ;;  %s962_s4 = inlined_call_operand.vmem [shape: f32[4,2], index: 4, kind: input, shape index: {}]   ;;  %s963_s5 = inlined_call_operand.vmem [shape: f32[1,64], index: 5, kind: input, shape index: {}]   ;;  %s964_s6 = inlined_call_operand.hbm [shape: f32[2,8,64], index: 6, kind: output, shape index: {0}]   ;;  %s965_s7 = inlined_call_operand.hbm [shape: f32[2,4,8,8], index: 7, kind: output, shape index: {1}]  }
   0x1   :  { %v28_v0 = vld [vmem:[%s961_s3] sm:$0x3]  ;;  %698 = vset.pattern.permute.xlu0 %v791_v4 }
   0x2   :  { %v31_v1 = vld [vmem:[%s958_s0] sm:$0xff]  ;;  %667 = vmatpush.msk.msra.mxu2 %vm41_vm0, %v28_v0 }
   0x3   :  { %v32_v2 = vld [vmem:[%s959_s1] sm:$0x3]  ;;  %668 = vmatmul.msk.f32.vlgmr.msra.gmra.mxu2 %vm37_vm1, %v31_v1 }
   0x4   :  { %v853_v3 = vld [vmem:[%s962_s4] sm:$0xf]  ;;  %669 = vmatpush.msk.msra.mxu3 %vm41_vm0, %v32_v2 }
   0x5   :  { %14 = vsyncpa [#allocation5], 0  ;;  %670 = vmatmul.msk.f32.vlgmr.msra.gmra.mxu3 %vm37_vm1, %v853_v3  ;;  %v792_v5 = vmov 0   ;;  %v793_v7 = vmov 3   ;;  %v27_v8 = vld [vmem:[%s960_s2] sm:$0xf] }
   0x6   :  { %700 = vset.pattern.permute.xlu2 %v792_v5  ;;  %34 = vst [vmem:[#allocation1] ss:$4 sm:$0xff] %v27_v8  ;;  %v794_v9 = vmov 1   ;;  %vm172_vm3 = vcmask 64512   ;;  %s795_s2 = smov 64   ;;  %v675_v54 = vld [vmem:[%s958_s0 + $0x8] sm:$0xff] }
   0x7   :  { %701 = vset.pattern.permute.xlu1 %v794_v9  ;;  %v676_v57 = vld [vmem:[%s959_s1 + $0x2] sm:$0x3]  ;;  %vm328_vm11 = vcmask 523264   ;;  %s646_s16 = sshll.u32 %s965_s7, 4  ;;  %s797_s17 = smov 128   ;;  %s647_s16 = int_to_ptr.hbm [resolvable:$true] %s646_s16 }
   0x8   :  { %s798_s18 = smov 8   ;;  %s799_s19 = smov [#allocation2]  }
   0x9   :  { %s631_s20 = sshll.u32 %s799_s19, 4  ;;  %s633_s23 = sshll.u32 %s964_s6, 4  ;;  %s632_s20 = int_to_ptr.vmem [resolvable:$true] %s631_s20  ;;  %s634_s23 = int_to_ptr.hbm [resolvable:$true] %s633_s23 }
   0xd   :  { %v36_v10 = vld.sshfl [vmem:[#allocation1 + $0x8] sm:$0xff pattern:$0x73625140]  ;;  %v35_v20 = vld.sshfl [vmem:[#allocation1] sm:$0xff pattern:$0x73625140] }
   0xe   :  { %665 = vmatpush.msk.msra.mxu1 %vm41_vm0, %v36_v10  ;;  %663 = vmatpush.msk.msra.mxu0 %vm41_vm0, %v35_v20  ;;  %338 = vst [vmem:[#allocation1] ss:$4 sm:$0xff] %v27_v8 }
   0xf   :  { %666 = vmatmul.msk.f32.vlgmr.msra.gmra.mxu1 %vm37_vm1, %v31_v1  ;;  %664 = vmatmul.msk.f32.vlgmr.msra.gmra.mxu0 %vm37_vm1, %v31_v1 }
  0x86   :  { %v106_v6 = vpop.f32.mrf.mxu2 }
  0x87   :  { %137 = vperm.xlu2 %700, %v106_v6   ;;  %149 = vperm.xlu0 %698, %v106_v6  }
  0x88   :  { %v132_v11 = vpop.f32.mrf.mxu3 }
  0x89   :  { %v152_v12 = vperm.slane %v132_v11, 2  ;;  %v158_v18 = vperm.slane %v132_v11, 3  ;;  %v146_v36 = vperm.slane %v132_v11, 1  ;;  %v140_v43 = vperm.slane %v132_v11, 0 }
  0x8c   :  { %v871_v28 = vpop.f32.mrf.mxu1  ;;  %v880_v42 = vpop.f32.mrf.mxu0 }
  0x8d   :  { %287 = vmatpush.msrb.mxu2 %v871_v28  ;;  %263 = vmatpush.msrb.mxu1 %v880_v42 }
  0x8f   :  { %699 = vset.pattern.permute.xlu0 %v793_v7  ;;  %681 = vmatpush.msk.msra.mxu2 %vm41_vm0, %v28_v0 }
  0x90   :  { %155 = vperm.xlu0 %699, %v106_v6  }
  0x98   :  { %702 = vset.pattern.permute.xlu0 %v791_v4 }
  0xe1   :  { %v138_v44 = vpop.permute.xlu2 %137 }
  0xe2   :  { %v141_v45 = vmul.f32 %v140_v43, %v138_v44 }
  0xe4   :  { %v164_v46 = vmul.f32 0.2, %v141_v45  ;;  %vm160_vm6 = vcmp.gt.f32.partialorder %v141_v45, 0.0 }
  0xe6   :  { %v168_v47 = vsel %vm160_vm6, %v141_v45, %v164_v46 }
  0xe7   :  { %v173_v48 = vsel %vm172_vm3, %v168_v47, -inf }
  0xf9   :  { %v150_v13 = vpop.permute.xlu0 %149 }
  0xfa   :  { %v153_v14 = vmul.f32 %v152_v12, %v150_v13 }
  0xfc   :  { %v166_v15 = vmul.f32 0.2, %v153_v14  ;;  %vm162_vm2 = vcmp.gt.f32.partialorder %v153_v14, 0.0 }
  0xfe   :  { %v170_v16 = vsel %vm162_vm2, %v153_v14, %v166_v15 }
  0xff   :  { %v179_v17 = vsel %vm172_vm3, %v170_v16, -inf }
 0x100   :  { %180 = vmax.xlane.f32.xlu1 %v179_v17 }
 0x102   :  { %v156_v19 = vpop.permute.xlu0 %155 }
 0x103   :  { %v159_v21 = vmul.f32 %v158_v18, %v156_v19 }
 0x105   :  { %v167_v22 = vmul.f32 0.2, %v159_v21  ;;  %vm163_vm4 = vcmp.gt.f32.partialorder %v159_v21, 0.0 }
 0x107   :  { %v171_v23 = vsel %vm163_vm4, %v159_v21, %v167_v22  ;;  %v340_v22 = vld.sshfl [vmem:[#allocation1 + $0x8] sm:$0xff pattern:$0x73625140] }
 0x108   :  { %v182_v24 = vsel %vm172_vm3, %v171_v23, -inf  ;;  %679 = vmatpush.msk.msra.mxu1 %vm41_vm0, %v340_v22 }
 0x109   :  { %183 = vmax.xlane.f32.xlu1 %v182_v24 }
 0x122   :  { %143 = vperm.xlu1 %701, %v106_v6  }
 0x12a   :  { %703 = vset.pattern.permute.xlu1 %v793_v7 }
 0x173   :  { %v181_v25 = vpop.xlane.xlu1 %180 }
 0x174   :  { %v187_v26 = vsub.f32 %v170_v16, %v181_v25 }
 0x176   :  { %v193_v27 = vmul.f32 1.442695, %v187_v26 }
 0x178   :  { %707 = vpow2.f32 %v193_v27 }
 0x17c   :  { %v184_v29 = vpop.xlane.xlu1 %183 }
 0x17d   :  { %v188_v30 = vsub.f32 %v171_v23, %v184_v29 }
 0x17e   :  { %v708_v31 = vpop.eup %707 }
 0x17f   :  { %v195_v32 = vmul.f32 1.442695, %v188_v30  ;;  %v203_v33 = vsel %vm172_vm3, %v708_v31, 0.0 }
 0x180   :  { %204 = vadd.xlane.f32.xlu2 %v203_v33 }
 0x181   :  { %709 = vpow2.f32 %v195_v32 }
 0x187   :  { %v710_v34 = vpop.eup %709 }
 0x188   :  { %v206_v35 = vsel %vm172_vm3, %v710_v34, 0.0 }
 0x189   :  { %207 = vadd.xlane.f32.xlu0 %v206_v35 }
 0x194   :  { %v144_v37 = vpop.permute.xlu1 %143 }
 0x195   :  { %v147_v38 = vmul.f32 %v146_v36, %v144_v37 }
 0x197   :  { %v165_v39 = vmul.f32 0.2, %v147_v38  ;;  %vm161_vm5 = vcmp.gt.f32.partialorder %v147_v38, 0.0 }
 0x198   :  { %295 = vrot.lane.b32.xlu2 %v871_v28, %s795_s2 }
 0x199   :  { %v169_v40 = vsel %vm161_vm5, %v147_v38, %v165_v39 }
 0x19a   :  { %v176_v41 = vsel %vm172_vm3, %v169_v40, -inf }
 0x19b   :  { %177 = vmax.xlane.f32.xlu1 %v176_v41 }
 0x1c1   :  { %174 = vmax.xlane.f32.xlu2 %v173_v48 }
 0x1d9   :  { %219 = vrot.lane.b32.xlu2 %v880_v42, %s795_s2 }
 0x1f3   :  { %v205_v49 = vpop.xlane.xlu2 %204 }
 0x1f4   :  { %711 = vrcp.f32 %v205_v49  ;;  %v931_v49 = vld [vmem:[%s963_s5] ss:$0 sm:$0xff]  ;;  %s796_s5 = smov [#allocation4]  }
 0x1f5   :  { %s644_s13 = sshll.u32 %s796_s5, 4  ;;  %s645_s13 = int_to_ptr.vmem [resolvable:$true] %s644_s13 }
 0x1fa   :  { %v712_v50 = vpop.eup %711 }
 0x1fb   :  { %v215_v51 = vmul.f32 %v712_v50, %v708_v31  ;;  %v886_v52 = vpop.permute.xlu2 %295 }
 0x1fc   :  { %v208_v53 = vpop.xlane.xlu0 %207  ;;  %316 = vmatpush.msrb.mxu3 %v886_v52 }
 0x1fd   :  { %713 = vrcp.f32 %v208_v53  ;;  %673 = vmatmul.msk.f32.vlgmr.msrb.gmra.mxu2 %vm172_vm3, %v215_v51  ;;  %332 = vst.msk [vmem:[#allocation4 + $0x10] sm:$0xff] %vm172_vm3, %v215_v51 }
 0x1fe   :  { %683 = vmatpush.msk.msra.mxu3 %vm41_vm0, %v676_v57 }
 0x203   :  { %v714_v55 = vpop.eup %713 }
 0x204   :  { %v216_v56 = vmul.f32 %v714_v55, %v710_v34 }
 0x205   :  { %682 = vmatmul.msk.f32.vlgmr.msra.gmra.mxu2 %vm37_vm1, %v675_v54 }
 0x206   :  { %674 = vmatmul.msk.f32.vlgmr.msrb.gmra.mxu3 %vm172_vm3, %v216_v56  ;;  %333 = vst.msk [vmem:[#allocation4 + $0x18] sm:$0xff] %vm172_vm3, %v216_v56 }
 0x20e   :  { %684 = vmatmul.msk.f32.vlgmr.msra.gmra.mxu3 %vm37_vm1, %v853_v3  ;;  %v178_v58 = vpop.xlane.xlu1 %177 }
 0x20f   :  { %v186_v61 = vsub.f32 %v169_v40, %v178_v58 }
 0x211   :  { %v191_v63 = vmul.f32 1.442695, %v186_v61 }
 0x234   :  { %v175_v59 = vpop.xlane.xlu2 %174 }
 0x235   :  { %v185_v60 = vsub.f32 %v168_v47, %v175_v59 }
 0x237   :  { %v189_v62 = vmul.f32 1.442695, %v185_v60 }
 0x239   :  { %715 = vpow2.f32 %v189_v62 }
 0x23a   :  { %717 = vpow2.f32 %v191_v63 }
 0x23c   :  { %v903_v0 = vpop.permute.xlu2 %219 }
 0x23d   :  { %240 = vmatpush.msrb.mxu0 %v903_v0  ;;  %v268_v43 = vadd.f32 %v903_v0, %v880_v42 }
 0x23f   :  { %v716_v1 = vpop.eup %715  ;;  %v293_v47 = vadd.f32 %v268_v43, %v871_v28 }
 0x240   :  { %v197_v2 = vsel %vm172_vm3, %v716_v1, 0.0  ;;  %v718_v4 = vpop.eup %717 }
 0x241   :  { %198 = vadd.xlane.f32.xlu0 %v197_v2  ;;  %v200_v5 = vsel %vm172_vm3, %v718_v4, 0.0  ;;  %v322_v51 = vadd.f32 %v886_v52, %v293_v47 }
 0x249   :  { %201 = vadd.xlane.f32.xlu0 %v200_v5 }
 0x280   :  { %v908_v3 = vpop.f32.mrf.mxu2 }
 0x288   :  { %v405_v6 = vpop.f32.mrf.mxu2 }
 0x289   :  { %451 = vperm.xlu1 %703, %v405_v6   ;;  %445 = vperm.xlu0 %702, %v405_v6  }
 0x28a   :  { %433 = vperm.xlu2 %700, %v405_v6  }
 0x291   :  { %704 = vset.pattern.permute.xlu1 %v794_v9  ;;  %705 = vset.pattern.permute.xlu0 %v793_v7  ;;  %v318_v9 = vpop.f32.mrf.mxu3  ;;  %v339_v7 = vld.sshfl [vmem:[#allocation1] sm:$0xff pattern:$0x73625140] }
 0x292   :  { %439 = vperm.xlu1 %704, %v405_v6   ;;  %677 = vmatpush.msk.msra.mxu0 %vm41_vm0, %v339_v7 }
 0x299   :  { %v428_v15 = vpop.f32.mrf.mxu3 }
 0x29a   :  { %v436_v16 = vperm.slane %v428_v15, 0  ;;  %v454_v23 = vperm.slane %v428_v15, 3  ;;  %v448_v24 = vperm.slane %v428_v15, 2  ;;  %v442_v36 = vperm.slane %v428_v15, 1 }
 0x2b4   :  { %v199_v8 = vpop.xlane.xlu0 %198 }
 0x2b5   :  { %719 = vrcp.f32 %v199_v8 }
 0x2bb   :  { %v720_v10 = vpop.eup %719 }
 0x2bc   :  { %v202_v11 = vpop.xlane.xlu0 %201  ;;  %v213_v12 = vmul.f32 %v720_v10, %v716_v1 }
 0x2bd   :  { %721 = vrcp.f32 %v202_v11 }
 0x2be   :  { %672 = vmatmul.msk.f32.vlgmr.msrb.gmra.mxu1 %vm172_vm3, %v213_v12  ;;  %330 = vst.msk [vmem:[#allocation4] sm:$0xff] %vm172_vm3, %v213_v12 }
 0x2c3   :  { %v722_v13 = vpop.eup %721 }
 0x2c4   :  { %v214_v14 = vmul.f32 %v722_v13, %v718_v4 }
 0x2c6   :  { %671 = vmatmul.msk.f32.vlgmr.msrb.gmra.mxu0 %vm172_vm3, %v214_v14  ;;  %331 = vst.msk [vmem:[#allocation4 + $0x8] sm:$0xff] %vm172_vm3, %v214_v14  ;;  %680 = vmatmul.msk.f32.vlgmr.msra.gmra.mxu1 %vm37_vm1, %v675_v54 }
 0x2ce   :  { %678 = vmatmul.msk.f32.vlgmr.msra.gmra.mxu0 %vm37_vm1, %v675_v54 }
 0x2e4   :  { %v434_v17 = vpop.permute.xlu2 %433 }
 0x2e5   :  { %v437_v18 = vmul.f32 %v436_v16, %v434_v17 }
 0x2e7   :  { %v460_v19 = vmul.f32 0.2, %v437_v18  ;;  %vm456_vm7 = vcmp.gt.f32.partialorder %v437_v18, 0.0 }
 0x2e9   :  { %v464_v20 = vsel %vm456_vm7, %v437_v18, %v460_v19 }
 0x2ea   :  { %v468_v21 = vsel %vm172_vm3, %v464_v20, -inf }
 0x2eb   :  { %469 = vmax.xlane.f32.xlu0 %v468_v21 }
 0x2fb   :  { %v452_v25 = vpop.permute.xlu1 %451  ;;  %v446_v26 = vpop.permute.xlu0 %445 }
 0x2fc   :  { %v455_v27 = vmul.f32 %v454_v23, %v452_v25  ;;  %v449_v29 = vmul.f32 %v448_v24, %v446_v26 }
 0x2fe   :  { %v463_v30 = vmul.f32 0.2, %v455_v27  ;;  %v462_v31 = vmul.f32 0.2, %v449_v29  ;;  %vm459_vm8 = vcmp.gt.f32.partialorder %v455_v27, 0.0  ;;  %vm458_vm9 = vcmp.gt.f32.partialorder %v449_v29, 0.0 }
 0x300   :  { %v467_v32 = vsel %vm459_vm8, %v455_v27, %v463_v30  ;;  %v466_v33 = vsel %vm458_vm9, %v449_v29, %v462_v31 }
 0x301   :  { %v477_v34 = vsel %vm172_vm3, %v467_v32, -inf  ;;  %v474_v35 = vsel %vm172_vm3, %v466_v33, -inf }
 0x302   :  { %478 = vmax.xlane.f32.xlu1 %v477_v34  ;;  %475 = vmax.xlane.f32.xlu2 %v474_v35 }
 0x304   :  { %v440_v37 = vpop.permute.xlu1 %439 }
 0x305   :  { %v443_v38 = vmul.f32 %v442_v36, %v440_v37 }
 0x307   :  { %v461_v39 = vmul.f32 0.2, %v443_v38  ;;  %vm457_vm10 = vcmp.gt.f32.partialorder %v443_v38, 0.0 }
 0x309   :  { %v465_v40 = vsel %vm457_vm10, %v443_v38, %v461_v39 }
 0x30a   :  { %v471_v41 = vsel %vm172_vm3, %v465_v40, -inf }
 0x30b   :  { %472 = vmax.xlane.f32.xlu2 %v471_v41 }
 0x33b   :  { %v265_v44 = vpop.f32.mrf.mxu1 }
 0x343   :  { %v242_v45 = vpop.f32.mrf.mxu0  ;;  %v385_v59 = vpop.f32.mrf.mxu1 }
 0x344   :  { %v266_v46 = vadd.f32 %v265_v44, %v242_v45  ;;  %582 = vmatpush.msrb.mxu2 %v385_v59 }
 0x346   :  { %v292_v48 = vadd.f32 %v908_v3, %v266_v46 }
 0x348   :  { %v321_v50 = vadd.f32 %v318_v9, %v292_v48 }
 0x34a   :  { %v326_v53 = vadd.f32 %v931_v49, %v321_v50 }
 0x34b   :  { %v365_v42 = vpop.f32.mrf.mxu0 }
 0x34c   :  { %v327_v54 = vadd.f32 %v326_v53, %v322_v51  ;;  %558 = vmatpush.msrb.mxu1 %v365_v42 }
 0x34e   :  { %329 = vst.msk [vmem:[#allocation2] sm:$0xff] %vm328_vm11, %v327_v54 }
 0x35e   :  { %v470_v55 = vpop.xlane.xlu0 %469 }
 0x35f   :  { %v480_v28 = vsub.f32 %v464_v20, %v470_v55 }
 0x361   :  { %v484_v56 = vmul.f32 1.442695, %v480_v28 }
 0x363   :  { %723 = vpow2.f32 %v484_v56 }
 0x369   :  { %v724_v57 = vpop.eup %723 }
 0x36a   :  { %v492_v58 = vsel %vm172_vm3, %v724_v57, 0.0 }
 0x36b   :  { %493 = vadd.xlane.f32.xlu0 %v492_v58 }
 0x375   :  { %v479_v60 = vpop.xlane.xlu1 %478  ;;  %v476_v52 = vpop.xlane.xlu2 %475 }
 0x376   :  { %v483_v61 = vsub.f32 %v467_v32, %v479_v60  ;;  %v482_v62 = vsub.f32 %v466_v33, %v476_v52 }
 0x378   :  { %v490_v63 = vmul.f32 1.442695, %v483_v61  ;;  %v488_v0 = vmul.f32 1.442695, %v482_v62 }
 0x37a   :  { %725 = vpow2.f32 %v490_v63 }
 0x37b   :  { %727 = vpow2.f32 %v488_v0 }
 0x37e   :  { %v473_v1 = vpop.xlane.xlu2 %472 }
 0x37f   :  { %514 = vrot.lane.b32.xlu0 %v365_v42, %s795_s2  ;;  %v481_v2 = vsub.f32 %v465_v40, %v473_v1 }
 0x380   :  { %v726_v4 = vpop.eup %725 }
 0x381   :  { %v728_v5 = vpop.eup %727  ;;  %v486_v3 = vmul.f32 1.442695, %v481_v2  ;;  %v501_v6 = vsel %vm172_vm3, %v726_v4, 0.0 }
 0x382   :  { %502 = vadd.xlane.f32.xlu2 %v501_v6  ;;  %v498_v8 = vsel %vm172_vm3, %v728_v5, 0.0 }
 0x383   :  { %729 = vpow2.f32 %v486_v3  ;;  %499 = vadd.xlane.f32.xlu1 %v498_v8 }
 0x389   :  { %v730_v10 = vpop.eup %729 }
 0x38a   :  { %v495_v11 = vsel %vm172_vm3, %v730_v10, 0.0 }
 0x38b   :  { %496 = vadd.xlane.f32.xlu1 %v495_v11 }
 0x39a   :  { %590 = vrot.lane.b32.xlu2 %v385_v59, %s795_s2 }
 0x3de   :  { %v494_v12 = vpop.xlane.xlu0 %493 }
 0x3df   :  { %731 = vrcp.f32 %v494_v12 }
 0x3e5   :  { %v732_v13 = vpop.eup %731 }
 0x3e6   :  { %v508_v14 = vmul.f32 %v732_v13, %v724_v57 }
 0x3e8   :  { %623 = vst.msk [vmem:[#allocation4 + $0x20] sm:$0xff] %vm172_vm3, %v508_v14  ;;  %686 = vmatmul.msk.f32.vlgmr.msrb.gmra.mxu1 %vm172_vm3, %v508_v14 }
 0x3f1   :  { %v515_v9 = vpop.permute.xlu0 %514 }
 0x3f2   :  { %535 = vmatpush.msrb.mxu0 %v515_v9  ;;  %v563_v16 = vadd.f32 %v515_v9, %v365_v42 }
 0x3f4   :  { %v588_v18 = vadd.f32 %v563_v16, %v385_v59 }
 0x3f5   :  { %v503_v15 = vpop.xlane.xlu2 %502 }
 0x3f6   :  { %v500_v7 = vpop.xlane.xlu1 %499  ;;  %733 = vrcp.f32 %v503_v15 }
 0x3f7   :  { %735 = vrcp.f32 %v500_v7 }
 0x3fc   :  { %v734_v17 = vpop.eup %733 }
 0x3fd   :  { %v736_v19 = vpop.eup %735  ;;  %v511_v20 = vmul.f32 %v734_v17, %v726_v4  ;;  %v591_v21 = vpop.permute.xlu2 %590 }
 0x3fe   :  { %v510_v22 = vmul.f32 %v736_v19, %v728_v5  ;;  %v617_v23 = vadd.f32 %v591_v21, %v588_v18  ;;  %v497_v24 = vpop.xlane.xlu1 %496  ;;  %611 = vmatpush.msrb.mxu3 %v591_v21 }
 0x3ff   :  { %626 = vst.msk [vmem:[#allocation4 + $0x38] sm:$0xff] %vm172_vm3, %v511_v20  ;;  %737 = vrcp.f32 %v497_v24  ;;  %688 = vmatmul.msk.f32.vlgmr.msrb.gmra.mxu3 %vm172_vm3, %v511_v20 }
 0x400   :  { %625 = vst.msk [vmem:[#allocation4 + $0x30] sm:$0xff] %vm172_vm3, %v510_v22  ;;  %687 = vmatmul.msk.f32.vlgmr.msrb.gmra.mxu2 %vm172_vm3, %v510_v22 }
 0x405   :  { %v738_v25 = vpop.eup %737 }
 0x406   :  { %v509_v26 = vmul.f32 %v738_v25, %v730_v10 }
 0x408   :  { %624 = vst.msk [vmem:[#allocation4 + $0x28] sm:$0xff] %vm172_vm3, %v509_v26  ;;  %685 = vmatmul.msk.f32.vlgmr.msrb.gmra.mxu0 %vm172_vm3, %v509_v26 }
 0x409   :  { %652 = dma.vmem_to_hbm [thread:$0]  %s645_s13, 1024, %s647_s16, [#allocation5], %s797_s17, %s797_s17, %s798_s18  }
 0x465   :  { %v560_v27 = vpop.f32.mrf.mxu1 }
 0x482   :  { %v613_v33 = vpop.f32.mrf.mxu3 }
 0x483   :  { %v584_v31 = vpop.f32.mrf.mxu2 }
 0x485   :  { %v537_v29 = vpop.f32.mrf.mxu0 }
 0x486   :  { %v561_v30 = vadd.f32 %v560_v27, %v537_v29 }
 0x488   :  { %v587_v32 = vadd.f32 %v584_v31, %v561_v30 }
 0x48a   :  { %v616_v34 = vadd.f32 %v613_v33, %v587_v32 }
 0x48c   :  { %v618_v35 = vadd.f32 %v931_v49, %v616_v34 }
 0x48e   :  { %v619_v36 = vadd.f32 %v618_v35, %v617_v23 }
 0x490   :  { %621 = vst.msk [vmem:[#allocation2 + $0x8] sm:$0xff] %vm328_vm11, %v619_v36 }
 0x491   :  { %639 = dma.vmem_to_hbm [thread:$0]  %s632_s20, 256, %s634_s23, [#allocation3], %s797_s17, %s797_s17, %s798_s18  }
 0x492   :  { %787 = dma.done.wait [#allocation3], 256  }
 0x493   :  { %788 = vsyncadd [#allocation3], 4294967040 }
 0x494   :  { %789 = dma.done.wait [#allocation5], 1024  }
 0x495   :  { %790 = vsyncadd [#allocation5], 4294966272 }
 0x496   :  { %661 = vsyncpa [#allocation3], 1 }
 0x497   :  { %662 = vsyncpa [#allocation5], 1 }

</bundles_post_ra>
